<compile_context>
chip_gen: v5e
topology: v5e:2x2
jax: 0.10.0
libtpu: 0.0.40
codegen_flags: <defaults>
</compile_context>

<pallas_src>
import functools

import jax
import jax.numpy as jnp
from jax.experimental import pallas as pl
from jax.experimental.pallas import tpu as pltpu

LN_EPS = 1e-5          # nn.LayerNorm default (the module's self.eps is unused in forward)
_LANE = 128            # TPU lane width
_SUBLANE = 16          # bf16 sublane packing


def _round_up(x, m):
    return (x + m - 1) // m * m


def _vmem_caps():
    """(working-set budget, scoped-vmem limit) in bytes, generation aware."""
    try:
        cap = int(pltpu.get_tpu_info().vmem_capacity_bytes)
    except Exception:
        cap = 64 * 1024 * 1024                    # conservative fallback (v7x per-TC VMEM)
    cap = max(cap, 32 * 1024 * 1024)              # guard against bogus queries
    return (cap * 5) // 8, (cap * 3) // 4         # ~62.5% working budget, 75% scoped limit


def _choose_tiles(n, f, d_pad, out_bytes, budget):
    """Pick (tile_n, tile_f) so the double-buffered working set fits `budget`."""
    # K (contraction) tiling over F: keep XW fully resident while it is small;
    # otherwise stream it in 128-aligned blocks (keeps tile_n large on v7x's 64 MiB).
    if 2 * f * d_pad * 2 <= budget // 4:
        tile_f = f
    else:
        tile_f = max(_LANE, (budget // (16 * d_pad)) // _LANE * _LANE)
        tile_f = min(tile_f, _round_up(f, _LANE))

    def fits(tn):
        a = 2 * tn * tile_f * 2            # A tile, bf16, double-buffered
        xw = 2 * tile_f * d_pad * 2        # XW tile, bf16, double-buffered
        o = 2 * tn * d_pad * out_bytes     # output tile, double-buffered
        acc = tn * d_pad * 4               # f32 accumulator scratch
        vecs = 2 * 3 * d_pad * 4           # bias / gamma / beta rows
        return a + xw + o + acc + vecs + (1 << 20) <= budget

    tile_n = min(_round_up(n, _SUBLANE), 2048)
    # Keep >= 2 row tiles whenever N allows it so the "parallel" grid axis can shard
    # across v7x's two TensorCores.
    if n > 2 * _SUBLANE:
        tile_n = min(tile_n, _round_up(pl.cdiv(n, 2), _SUBLANE))
    while tile_n > _SUBLANE and not fits(tile_n):
        tile_n = max(_SUBLANE, _round_up(tile_n // 2, _SUBLANE))
    return tile_n, tile_f


def _func_to_node_sum_kernel(a_ref, xw_ref, b_ref, g_ref, beta_ref, o_ref, acc_ref,
                             *, d_real, f_rem):
    k = pl.program_id(1)

    @pl.when(k == 0)
    def _():
        acc_ref[...] = jnp.zeros_like(acc_ref)

    xw = xw_ref[...]
    if f_rem:
        # Last K-block over F is partial: zero the out-of-bounds XW rows so the
        # corresponding (garbage) A columns contribute nothing to the accumulation.
        row = jax.lax.broadcasted_iota(jnp.int32, xw.shape, 0)
        limit = jnp.where(k == pl.num_programs(1) - 1, f_rem, xw.shape[0])
        xw = jnp.where(row < limit, xw, jnp.zeros_like(xw))

    # Single native-bf16 MXU matmul per (row-tile, K-block), f32 accumulation.
    acc_ref[...] += jnp.dot(a_ref[...], xw, preferred_element_type=jnp.float32)

    @pl.when(k == pl.num_programs(1) - 1)
    def _():
        h = acc_ref[...] + b_ref[...]
        d_pad = h.shape[-1]
        inv_d = 1.0 / float(d_real)
        # Padded lanes of h are exactly zero (XW and bias are zero-padded), so the
        # mean needs no mask; only the centered value does (single (1, d_pad) row).
        mu = jnp.sum(h, axis=-1, keepdims=True) * inv_d
        cen = h - mu
        if d_pad != d_real:
            lane = jax.lax.broadcasted_iota(jnp.int32, (1, d_pad), 1)
            cen = cen * (lane < d_real).astype(jnp.float32)
        var = jnp.sum(cen * cen, axis=-1, keepdims=True) * inv_d
        hn = cen * jax.lax.rsqrt(var + LN_EPS)
        out = hn * g_ref[...] + beta_ref[...]
        o_ref[...] = jnp.maximum(out, 0.0).astype(o_ref.dtype)


def func_to_node_sum(A_fn, x_f, b_n, params, *, out_dtype=jnp.float32):
    """Pallas implementation of FuncToNodeSum.forward.

    A_fn:  [N, F] 0/1 adjacency. Pass it as bf16 to avoid any wrapper-side copy
           (0/1 is exact in bf16); other dtypes are cast once.
    x_f:   [F, D] function-node features.
    b_n:   [N]    batch assignment (does not influence the returned value).
    params: {'w': [D, D] (PyTorch out,in layout), 'b': [D], 'gamma': [D], 'beta': [D]}
    out_dtype: jnp.float32 (module default) or jnp.bfloat16 to halve the output stream.
    """
    del b_n  # unused by the reference forward's return value
    N, F = A_fn.shape
    Fd, D = x_f.shape
    assert F == Fd

    f32 = jnp.float32
    # Fold the Linear into the adjacency matmul: A @ (x_f @ W.T) + b.
    # XW is computed once in f32 (tiny) and rounded to bf16 so the big matmul runs on
    # the MXU's native bf16 path.
    xw = x_f.astype(f32) @ params["w"].astype(f32).T          # [F, D]

    D_pad = _round_up(D, _LANE)
    out_bytes = jnp.dtype(out_dtype).itemsize
    budget, vmem_limit = _vmem_caps()
    tile_n, tile_f = _choose_tiles(N, F, D_pad, out_bytes, budget)

    # A streams straight from HBM (no pad, no copy when it is already bf16).
    A_bf16 = A_fn if A_fn.dtype == jnp.bfloat16 else A_fn.astype(jnp.bfloat16)
    xw_p = jnp.pad(xw, ((0, 0), (0, D_pad - D))).astype(jnp.bfloat16)
    b_p = jnp.pad(params["b"].astype(f32), (0, D_pad - D)).reshape(1, D_pad)
    g_p = jnp.pad(params["gamma"].astype(f32), (0, D_pad - D)).reshape(1, D_pad)
    beta_p = jnp.pad(params["beta"].astype(f32), (0, D_pad - D)).reshape(1, D_pad)

    grid = (pl.cdiv(N, tile_n), pl.cdiv(F, tile_f))
    kernel = functools.partial(_func_to_node_sum_kernel, d_real=D, f_rem=F % tile_f)

    out = pl.pallas_call(
        kernel,
        out_shape=jax.ShapeDtypeStruct((N, D_pad), out_dtype),
        grid_spec=pltpu.PrefetchScalarGridSpec(
            num_scalar_prefetch=0,
            grid=grid,
            in_specs=[
                pl.BlockSpec((tile_n, tile_f), lambda i, k: (i, k)),   # A row/K tile (bf16)
                pl.BlockSpec((tile_f, D_pad), lambda i, k: (k, 0)),    # XW (resident or K-streamed)
                pl.BlockSpec((1, D_pad), lambda i, k: (0, 0)),         # Linear bias
                pl.BlockSpec((1, D_pad), lambda i, k: (0, 0)),         # LN gamma
                pl.BlockSpec((1, D_pad), lambda i, k: (0, 0)),         # LN beta
            ],
            out_specs=pl.BlockSpec((tile_n, D_pad), lambda i, k: (i, 0)),
            scratch_shapes=[pltpu.VMEM((tile_n, D_pad), jnp.float32)],
        ),
        compiler_params=pltpu.CompilerParams(
            dimension_semantics=("parallel", "arbitrary"),
            vmem_limit_bytes=vmem_limit,
        ),
    )(A_bf16, xw_p, b_p, g_p, beta_p)

    return out if D_pad == D else out[:, :D]


def _reference(A_fn_f32, x_f, params):
    feats = A_fn_f32 @ x_f
    h = feats @ params["w"].T + params["b"]
    mu = jnp.mean(h, axis=-1, keepdims=True)
    var = jnp.mean((h - mu) ** 2, axis=-1, keepdims=True)
    hn = (h - mu) / jnp.sqrt(var + LN_EPS)
    return jnp.maximum(hn * params["gamma"] + params["beta"], 0.0)


if __name__ == "__main__":
    key = jax.random.PRNGKey(0)
    N, F, D = 16, 8, 32  # nodes, functions, vector_dim

    k1, k2, k3, k4 = jax.random.split(key, 4)
    # Sparse-ish 0/1 adjacency, produced directly in bf16 (exact) so the kernel streams
    # it from HBM without any wrapper-side pad/cast copy.
    A_fn = (jax.random.uniform(k1, (N, F)) < 0.3).astype(jnp.bfloat16)
    x_f = jax.random.normal(k2, (F, D), dtype=jnp.float32)
    b_n = jnp.zeros((N,), dtype=jnp.int32)

    # Deterministic parameter init (xavier-normal-like for the Linear weight).
    w = jax.random.normal(k3, (D, D), dtype=jnp.float32) * (2.0 / (D + D)) ** 0.5
    b = jax.random.normal(k4, (D,), dtype=jnp.float32) * 0.01
    params = {"w": w, "b": b,
              "gamma": jnp.ones((D,), jnp.float32),
              "beta": jnp.zeros((D,), jnp.float32)}

    out = jax.block_until_ready(func_to_node_sum(A_fn, x_f, b_n, params))

    ref = _reference(A_fn.astype(jnp.float32), x_f, params)
    assert out.shape == (N, D)
    # bf16 XW (and the A@(x_f@W.T) refold) change rounding vs the pure-f32 reference;
    # post-LayerNorm values are O(1), so standard mixed-precision tolerance applies.
    assert jnp.allclose(out, ref, atol=2e-2, rtol=2e-2), (
        f"mismatch vs reference: max abs diff {jnp.max(jnp.abs(out - ref)):.3e}")

    print("KERNEL_OK")
</pallas_src>

<mosaic_0001>
module attributes {stable_mosaic.version = 11 : i64} {
  func.func @_func_to_node_sum_kernel(%arg0: i32, %arg1: i32, %arg2: memref<16x8xbf16, #tpu.memory_space<vmem>>, %arg3: memref<8x128xbf16, #tpu.memory_space<vmem>>, %arg4: memref<1x128xf32, #tpu.memory_space<vmem>>, %arg5: memref<1x128xf32, #tpu.memory_space<vmem>>, %arg6: memref<1x128xf32, #tpu.memory_space<vmem>>, %arg7: memref<16x128xf32, #tpu.memory_space<vmem>>, %arg8: memref<16x128xf32, #tpu.memory_space<vmem>>) attributes {dimension_semantics = [#tpu.dimension_semantics<parallel>, #tpu.dimension_semantics<arbitrary>], iteration_bounds = array<i64: 1, 1>, scalar_prefetch = 0 : i64, scratch_operands = 1 : i64, tpu.core_type = #tpu.core_type<tc>, window_params = [{transform_indices = @transform_0, window_bounds = array<i64: 16, 8>}, {transform_indices = @transform_1, window_bounds = array<i64: 8, 128>}, {pipeline_mode = #tpu.pipeline_mode<synchronous>, transform_indices = @transform_2, window_bounds = array<i64: 1, 128>}, {pipeline_mode = #tpu.pipeline_mode<synchronous>, transform_indices = @transform_3, window_bounds = array<i64: 1, 128>}, {pipeline_mode = #tpu.pipeline_mode<synchronous>, transform_indices = @transform_4, window_bounds = array<i64: 1, 128>}, {transform_indices = @transform_5, window_bounds = array<i64: 16, 128>}]} {
    %c0_i32 = arith.constant 0 : i32
    %0 = arith.cmpi eq, %arg1, %c0_i32 : i32
    %1 = arith.extui %0 : i1 to i32
    %c0_i32_0 = arith.constant 0 : i32
    %2 = arith.cmpi ne, %1, %c0_i32_0 : i32
    scf.if %2 {
      %cst_10 = arith.constant 0.000000e+00 : f32
      %12 = vector.broadcast %cst_10 : f32 to vector<16x128xf32>
      %c0_11 = arith.constant 0 : index
      %c0_12 = arith.constant 0 : index
      %13 = vector.load %arg8[%c0_11, %c0_12] : memref<16x128xf32, #tpu.memory_space<vmem>>, vector<16x128xf32>
      tpu.vector_store %arg8[%c0_11, %c0_12], %12 {strides = array<i32>} : memref<16x128xf32, #tpu.memory_space<vmem>>, vector<16x128xf32>,
    } else {
    }
    %c0 = arith.constant 0 : index
    %c0_1 = arith.constant 0 : index
    %3 = vector.load %arg3[%c0, %c0_1] : memref<8x128xbf16, #tpu.memory_space<vmem>>, vector<8x128xbf16>
    %c0_2 = arith.constant 0 : index
    %c0_3 = arith.constant 0 : index
    %4 = vector.load %arg8[%c0_2, %c0_3] : memref<16x128xf32, #tpu.memory_space<vmem>>, vector<16x128xf32>
    %c0_4 = arith.constant 0 : index
    %c0_5 = arith.constant 0 : index
    %5 = vector.load %arg2[%c0_4, %c0_5] : memref<16x8xbf16, #tpu.memory_space<vmem>>, vector<16x8xbf16>
    %cst = arith.constant dense<0.000000e+00> : vector<16x128xf32>
    %6 = tpu.matmul %5, %3, %cst {dimension_numbers = #tpu.dot_dimension_numbers<[1], [0], [0], [1], [0, 0, 1, 1], [], []>} : vector<16x8xbf16>, vector<8x128xbf16>, vector<16x128xf32> -> vector<16x128xf32>
    %7 = arith.addf %4, %6 : vector<16x128xf32>
    %c0_6 = arith.constant 0 : index
    %c0_7 = arith.constant 0 : index
    %8 = vector.load %arg8[%c0_6, %c0_7] : memref<16x128xf32, #tpu.memory_space<vmem>>, vector<16x128xf32>
    tpu.vector_store %arg8[%c0_6, %c0_7], %7 {strides = array<i32>} : memref<16x128xf32, #tpu.memory_space<vmem>>, vector<16x128xf32>,
    %c0_i32_8 = arith.constant 0 : i32
    %9 = arith.cmpi eq, %arg1, %c0_i32_8 : i32
    %10 = arith.extui %9 : i1 to i32
    %c0_i32_9 = arith.constant 0 : i32
    %11 = arith.cmpi ne, %10, %c0_i32_9 : i32
    scf.if %11 {
      %c0_10 = arith.constant 0 : index
      %c0_11 = arith.constant 0 : index
      %12 = vector.load %arg8[%c0_10, %c0_11] : memref<16x128xf32, #tpu.memory_space<vmem>>, vector<16x128xf32>
      %c0_12 = arith.constant 0 : index
      %c0_13 = arith.constant 0 : index
      %13 = vector.load %arg4[%c0_12, %c0_13] : memref<1x128xf32, #tpu.memory_space<vmem>>, vector<1x128xf32>
      %14 = vector.broadcast %13 : vector<1x128xf32> to vector<16x128xf32>
      %15 = arith.addf %12, %14 : vector<16x128xf32>
      %cst_14 = arith.constant dense<0.000000e+00> : vector<16xf32>
      %16 = vector.multi_reduction <add>, %15, %cst_14 [1] : vector<16x128xf32> to vector<16xf32>
      %17 = vector.shape_cast %16 : vector<16xf32> to vector<16x1xf32>
      %cst_15 = arith.constant 3.125000e-02 : f32
      %18 = vector.broadcast %cst_15 : f32 to vector<16x1xf32>
      %19 = arith.mulf %17, %18 : vector<16x1xf32>
      %20 = vector.broadcast %19 : vector<16x1xf32> to vector<16x128xf32>
      %21 = arith.subf %15, %20 : vector<16x128xf32>
      %22 = tpu.iota {dimensions = array<i32: 1>} : vector<1x128xi32>
      %c32_i32 = arith.constant 32 : i32
      %23 = vector.broadcast %c32_i32 : i32 to vector<1x128xi32>
      %24 = arith.cmpi slt, %22, %23 : vector<1x128xi32>
      %25 = arith.extui %24 : vector<1x128xi1> to vector<1x128xi32>
      %26 = arith.sitofp %25 : vector<1x128xi32> to vector<1x128xf32>
      %27 = vector.broadcast %26 : vector<1x128xf32> to vector<16x128xf32>
      %28 = arith.mulf %21, %27 : vector<16x128xf32>
      %29 = arith.mulf %28, %28 : vector<16x128xf32>
      %cst_16 = arith.constant dense<0.000000e+00> : vector<16xf32>
      %30 = vector.multi_reduction <add>, %29, %cst_16 [1] : vector<16x128xf32> to vector<16xf32>
      %31 = vector.shape_cast %30 : vector<16xf32> to vector<16x1xf32>
      %cst_17 = arith.constant 3.125000e-02 : f32
      %32 = vector.broadcast %cst_17 : f32 to vector<16x1xf32>
      %33 = arith.mulf %31, %32 : vector<16x1xf32>
      %cst_18 = arith.constant 9.99999974E-6 : f32
      %34 = vector.broadcast %cst_18 : f32 to vector<16x1xf32>
      %35 = arith.addf %33, %34 : vector<16x1xf32>
      %36 = math.rsqrt %35 : vector<16x1xf32>
      %37 = vector.broadcast %36 : vector<16x1xf32> to vector<16x128xf32>
      %38 = arith.mulf %28, %37 : vector<16x128xf32>
      %c0_19 = arith.constant 0 : index
      %c0_20 = arith.constant 0 : index
      %39 = vector.load %arg5[%c0_19, %c0_20] : memref<1x128xf32, #tpu.memory_space<vmem>>, vector<1x128xf32>
      %40 = vector.broadcast %39 : vector<1x128xf32> to vector<16x128xf32>
      %41 = arith.mulf %38, %40 : vector<16x128xf32>
      %c0_21 = arith.constant 0 : index
      %c0_22 = arith.constant 0 : index
      %42 = vector.load %arg6[%c0_21, %c0_22] : memref<1x128xf32, #tpu.memory_space<vmem>>, vector<1x128xf32>
      %43 = vector.broadcast %42 : vector<1x128xf32> to vector<16x128xf32>
      %44 = arith.addf %41, %43 : vector<16x128xf32>
      %cst_23 = arith.constant 0.000000e+00 : f32
      %45 = vector.broadcast %cst_23 : f32 to vector<16x128xf32>
      %46 = arith.maximumf %44, %45 : vector<16x128xf32>
      %c0_24 = arith.constant 0 : index
      %c0_25 = arith.constant 0 : index
      %47 = vector.load %arg7[%c0_24, %c0_25] : memref<16x128xf32, #tpu.memory_space<vmem>>, vector<16x128xf32>
      tpu.vector_store %arg7[%c0_24, %c0_25], %46 {strides = array<i32>} : memref<16x128xf32, #tpu.memory_space<vmem>>, vector<16x128xf32>,
    } else {
    }
    return
  }
  func.func @transform_0(%arg0: i32, %arg1: i32) -> (i32, i32) {
    %c0_i32 = arith.constant 0 : i32
    return %arg0, %arg1 : i32, i32
  }
  func.func @transform_1(%arg0: i32, %arg1: i32) -> (i32, i32) {
    %c0_i32 = arith.constant 0 : i32
    %c0_i32_0 = arith.constant 0 : i32
    return %arg1, %c0_i32 : i32, i32
  }
  func.func @transform_2(%arg0: i32, %arg1: i32) -> (i32, i32) {
    %c0_i32 = arith.constant 0 : i32
    %c0_i32_0 = arith.constant 0 : i32
    %c0_i32_1 = arith.constant 0 : i32
    return %c0_i32, %c0_i32_0 : i32, i32
  }
  func.func @transform_3(%arg0: i32, %arg1: i32) -> (i32, i32) {
    %c0_i32 = arith.constant 0 : i32
    %c0_i32_0 = arith.constant 0 : i32
    %c0_i32_1 = arith.constant 0 : i32
    return %c0_i32, %c0_i32_0 : i32, i32
  }
  func.func @transform_4(%arg0: i32, %arg1: i32) -> (i32, i32) {
    %c0_i32 = arith.constant 0 : i32
    %c0_i32_0 = arith.constant 0 : i32
    %c0_i32_1 = arith.constant 0 : i32
    return %c0_i32, %c0_i32_0 : i32, i32
  }
  func.func @transform_5(%arg0: i32, %arg1: i32) -> (i32, i32) {
    %c0_i32 = arith.constant 0 : i32
    %c0_i32_0 = arith.constant 0 : i32
    return %arg0, %c0_i32 : i32, i32
  }
}

</mosaic_0001>

<bundles_post_ra>
// kernel: tpu_custom_call.1
= control target key start
LH: loop header
LB: loop body
LE: loop exit
PB: predicated region body
PF: predicated region fallthrough
CT: control target
= control target key end

     0   :  { %vm42_vm0 = vcmask 1043456   ;;  %vm38_vm1 = vcmask 64512   ;;  %s252_s0 = inlined_call_operand.vmem [shape: bf16[16,8], index: 0, kind: input, shape index: {}]   ;;  %s253_s1 = inlined_call_operand.vmem [shape: bf16[8,128], index: 1, kind: input, shape index: {}]   ;;  %s254_s2 = inlined_call_operand.vmem [shape: f32[1,128], index: 2, kind: input, shape index: {}]   ;;  %s255_s3 = inlined_call_operand.vmem [shape: f32[1,128], index: 3, kind: input, shape index: {}]   ;;  %s256_s4 = inlined_call_operand.vmem [shape: f32[1,128], index: 4, kind: input, shape index: {}]   ;;  %s257_s5 = inlined_call_operand.hbm [shape: f32[16,128], index: 5, kind: output, shape index: {}]  }
   0x1   :  { %v28_v0 = vld [vmem:[%s253_s1] sm:$0xf] }
   0x2   :  { %v44_v1 = vsel %vm42_vm0, %v28_v0, 0  ;;  %v162_v2 = vld [vmem:[%s252_s0] sm:$0xff] }
   0x3   :  { %53 = vmatpush.bf16.msra.mxu0 %v44_v1 }
   0x4   :  { %10 = vsyncpa [#allocation4], 0  ;;  %v167_v3 = vld [vmem:[%s254_s2] ss:$0 sm:$0xff]  ;;  %v83_v8 = vlaneseq  ;;  %v200_v12 = vmov 0.0   ;;  %s144_s28 = sshll.u32 %s257_s5, 4  ;;  %s145_s28 = int_to_ptr.hbm [resolvable:$true] %s144_s28 }
   0x5   :  { %v168_v36 = vld [vmem:[%s255_s3] ss:$0 sm:$0xff]  ;;  %s201_s3 = smov [#allocation3]   ;;  %s203_s29 = smov 8  }
   0x6   :  { %160 = vmatmul.msk.bf16.vlgmr.msra.gmra.mxu0 %vm38_vm1, %v162_v2  ;;  %v84_v9 = vand.u32 127, %v83_v8  ;;  %v169_v40 = vld [vmem:[%s256_s4] ss:$0 sm:$0xff]  ;;  %s142_s25 = sshll.u32 %s201_s3, 4  ;;  %s202_s4 = smov 128   ;;  %s143_s25 = int_to_ptr.vmem [resolvable:$true] %s142_s25 }
   0x8   :  { %vm85_vm2 = vcmp.lt.s32.totalorder %v84_v9, 32 }
   0x9   :  { %v161_v13 = vsel %vm85_vm2, 1.0, %v200_v12 }
  0x83   :  { %v55_v4 = vpop.f32.mrf.mxu0 }
  0x84   :  { %v73_v5 = vadd.f32 %v167_v3, %v55_v4 }
  0x86   :  { %75 = vadd.xlane.f32.xlu0 %v73_v5 }
  0x8b   :  { %v57_v6 = vpop.f32.mrf.mxu0 }
  0x8c   :  { %v74_v7 = vadd.f32 %v167_v3, %v57_v6 }
  0x8e   :  { %77 = vadd.xlane.f32.xlu0 %v74_v7 }
  0xf9   :  { %v76_v10 = vpop.xlane.xlu0 %75 }
  0xfa   :  { %v79_v11 = vmul.f32 0.03125, %v76_v10 }
  0xfc   :  { %v81_v14 = vsub.f32 %v73_v5, %v79_v11 }
  0xfe   :  { %v88_v15 = vmul.f32 %v161_v13, %v81_v14 }
 0x100   :  { %v90_v16 = vmul.f32 %v88_v15, %v88_v15 }
 0x101   :  { %v78_v17 = vpop.xlane.xlu0 %77 }
 0x102   :  { %v80_v18 = vmul.f32 0.03125, %v78_v17  ;;  %92 = vadd.xlane.f32.xlu1 %v90_v16 }
 0x104   :  { %v82_v19 = vsub.f32 %v74_v7, %v80_v18 }
 0x106   :  { %v89_v20 = vmul.f32 %v161_v13, %v82_v19 }
 0x108   :  { %v91_v21 = vmul.f32 %v89_v20, %v89_v20 }
 0x10a   :  { %94 = vadd.xlane.f32.xlu1 %v91_v21 }
 0x175   :  { %v93_v22 = vpop.xlane.xlu1 %92 }
 0x176   :  { %v96_v23 = vmul.f32 0.03125, %v93_v22 }
 0x178   :  { %v98_v24 = vadd.f32 1e-05, %v96_v23 }
 0x17a   :  { %170 = vrsqrt.f32 %v98_v24  ;;  %vm106_vm4 = vweird.f32 %v98_v24 }
 0x17d   :  { %v95_v25 = vpop.xlane.xlu1 %94 }
 0x17e   :  { %v97_v26 = vmul.f32 0.03125, %v95_v25 }
 0x180   :  { %v171_v27 = vpop.eup %170  ;;  %v99_v28 = vadd.f32 1e-05, %v97_v26 }
 0x181   :  { %v101_v29 = vmul.f32 %v171_v27, %v98_v24  ;;  %vm107_vm3 = vweird.f32 %v171_v27 }
 0x182   :  { %172 = vrsqrt.f32 %v99_v28  ;;  %vm108_vm5 = vmor %vm106_vm4, %vm107_vm3  ;;  %vm116_vm7 = vweird.f32 %v99_v28 }
 0x183   :  { %v102_v30 = vmul.f32 %v171_v27, %v101_v29 }
 0x185   :  { %v103_v31 = vmul.f32 0.5, %v102_v30 }
 0x187   :  { %v104_v32 = vsub.f32 1.5, %v103_v31 }
 0x188   :  { %v173_v33 = vpop.eup %172 }
 0x189   :  { %v105_v34 = vmul.f32 %v171_v27, %v104_v32  ;;  %v111_v35 = vmul.f32 %v173_v33, %v99_v28  ;;  %vm117_vm6 = vweird.f32 %v173_v33 }
 0x18a   :  { %vm118_vm8 = vmor %vm116_vm7, %vm117_vm6 }
 0x18b   :  { %v109_v37 = vsel %vm108_vm5, %v171_v27, %v105_v34  ;;  %v112_v38 = vmul.f32 %v173_v33, %v111_v35 }
 0x18c   :  { %v120_v39 = vmul.f32 %v109_v37, %v88_v15 }
 0x18d   :  { %v113_v41 = vmul.f32 0.5, %v112_v38 }
 0x18e   :  { %v126_v42 = vmul.f32 %v168_v36, %v120_v39 }
 0x18f   :  { %v114_v43 = vsub.f32 1.5, %v113_v41 }
 0x190   :  { %v132_v44 = vadd.f32 %v169_v40, %v126_v42 }
 0x191   :  { %v115_v45 = vmul.f32 %v173_v33, %v114_v43 }
 0x192   :  { %v134_v46 = vmax.f32 %v132_v44, 0.0 }
 0x193   :  { %v119_v47 = vsel %vm118_vm8, %v173_v33, %v115_v45 }
 0x194   :  { %v121_v48 = vmul.f32 %v119_v47, %v89_v20  ;;  %136 = vst [vmem:[#allocation3] sm:$0xff] %v134_v46 }
 0x196   :  { %v127_v49 = vmul.f32 %v168_v36, %v121_v48 }
 0x198   :  { %v133_v50 = vadd.f32 %v169_v40, %v127_v49 }
 0x19a   :  { %v135_v51 = vmax.f32 %v133_v50, 0.0 }
 0x19c   :  { %137 = vst [vmem:[#allocation3 + $0x8] sm:$0xff] %v135_v51 }
 0x19d   :  { %150 = dma.vmem_to_hbm [thread:$0]  %s143_s25, 256, %s145_s28, [#allocation4], %s202_s4, %s202_s4, %s203_s29  }
 0x19e   :  { %198 = dma.done.wait [#allocation4], 256  }
 0x19f   :  { %199 = vsyncadd [#allocation4], 4294967040 }
 0x1a0   :  { %155 = vsyncpa [#allocation4], 1 }

</bundles_post_ra>
